<compile_context>
chip_gen: v7x
topology: tpu7x:2x2x1
jax: 0.10.0
libtpu: 0.0.40
codegen_flags: <defaults>
</compile_context>

<pallas_src>
import functools

import jax
import jax.numpy as jnp
from jax import lax
from jax.experimental import pallas as pl
from jax.experimental.pallas import tpu as pltpu

EPS = 1e-5                      # torch.nn.LayerNorm default
_TARGET_BLOCK_BYTES = 4 << 20   # ~4 MiB pipelined blocks already hit HBM roofline
_MIN_STEPS = 4                  # aim for >= 4 grid steps so the pipeline overlaps


def _vmem_caps():
    """(vmem_limit_bytes, per-step budget) derived from the actual chip."""
    try:
        cap = int(pltpu.get_tpu_info().vmem_capacity_bytes)
    except Exception:  # pragma: no cover - conservative default (v7x per-TC)
        cap = 64 << 20
    limit = max(16 << 20, min(cap - (16 << 20), 100 << 20))  # leave headroom
    budget = limit // 2                                      # pipeline bufs + temps
    return limit, budget


# ----------------------------------------------------------------------------
# Fused single-pass path: one (tb, L, C) block per grid step.
# ----------------------------------------------------------------------------
def _my_layernorm_kernel(x_ref, g_ref, b_ref, o_ref, *, inv_c, inv_l):
    # x_ref: (TB, L, C) block; g_ref / b_ref: (1, 1, C); o_ref: (TB, L, C).
    x = x_ref[...].astype(jnp.float32)

    # Two-pass layernorm statistics in f32 (numerically safe for offset data).
    mean = jnp.sum(x, axis=-1, keepdims=True) * inv_c          # (TB, L, 1)
    xc = x - mean
    var = jnp.sum(xc * xc, axis=-1, keepdims=True) * inv_c     # (TB, L, 1)

    x_hat = xc * lax.rsqrt(var + EPS)                          # (TB, L, C)
    x_hat = x_hat * g_ref[...] + b_ref[...]

    # Subtract the per-(batch, channel) mean over the sequence dim.
    seq_bias = jnp.sum(x_hat, axis=1, keepdims=True) * inv_l   # (TB, 1, C)
    o_ref[...] = (x_hat - seq_bias).astype(o_ref.dtype)


def _pick_batch_block(B, L, C, itemsize, budget):
    """Batch block size; 0 means even a single batch block does not fit VMEM."""
    per_batch_block = L * C * itemsize
    # Realistic per-step VMEM cost: double-buffered in + out blocks (2 each)
    # plus ~4 f32 full-block temporaries materialized by the body.
    per_batch_cost = L * C * (4 * itemsize + 4 * 4)
    if per_batch_cost > budget:
        return 0                                    # -> two-pass L-tiled path

    tb = min(B,
             max(1, budget // per_batch_cost),
             max(1, _TARGET_BLOCK_BYTES // max(per_batch_block, 1)))

    # Keep >= _MIN_STEPS pipelined grid steps when the batch allows it.
    if B >= _MIN_STEPS:
        tb = min(tb, max(1, B // _MIN_STEPS))

    # Prefer an even number of grid steps (v7x megacore balance): take the
    # largest nearby block size that yields an even step count.
    best = tb
    for cand in range(tb, max(0, tb // 2), -1):
        if pl.cdiv(B, cand) % 2 == 0:
            best = cand
            break

    # If everything collapsed to a single big step, split it so both v7x
    # TensorCores get work (only worth it when each step moves >= ~1 MiB).
    if B > 1 and pl.cdiv(B, best) == 1 and best * per_batch_block >= (1 << 20):
        best = max(1, (B + 1) // 2)
    return best


# ----------------------------------------------------------------------------
# Two-pass L-tiled fallback (large L*C, e.g. on v7x's 64 MiB VMEM).
# ----------------------------------------------------------------------------
def _ln_sum_kernel(x_ref, g_ref, b_ref, xhat_ref, sum_ref, *, inv_c):
    # x_ref: (1, tl, C); sum_ref: (1, 1, C) f32, revisited across the L axis.
    x = x_ref[...].astype(jnp.float32)
    mean = jnp.sum(x, axis=-1, keepdims=True) * inv_c
    xc = x - mean
    var = jnp.sum(xc * xc, axis=-1, keepdims=True) * inv_c
    x_hat = xc * lax.rsqrt(var + EPS) * g_ref[...] + b_ref[...]
    xhat_ref[...] = x_hat.astype(xhat_ref.dtype)

    @pl.when(pl.program_id(1) == 0)
    def _():
        sum_ref[...] = jnp.zeros_like(sum_ref)

    sum_ref[...] += jnp.sum(x_hat, axis=1, keepdims=True)


def _sub_bias_kernel(xhat_ref, sum_ref, o_ref, *, inv_l):
    o_ref[...] = (xhat_ref[...].astype(jnp.float32)
                  - sum_ref[...] * inv_l).astype(o_ref.dtype)


def _pick_seq_block(L, C, itemsize, budget):
    """Largest multiple-of-8 divisor of L whose block fits the budget/target."""
    per_row_cost = C * (4 * itemsize + 4 * 4)
    per_row_block = C * itemsize
    cap_rows = min(max(8, budget // max(per_row_cost, 1)),
                   max(8, _TARGET_BLOCK_BYTES // max(per_row_block, 1)))
    candidates = [tl for tl in range(8, L + 1, 8) if L % tl == 0 and tl <= cap_rows]
    return max(candidates) if candidates else L


def _my_layernorm_two_pass(x, gamma, beta, limit, budget, tl=None):
    B, L, C = x.shape
    g = gamma.reshape(1, 1, C).astype(jnp.float32)
    b = beta.reshape(1, 1, C).astype(jnp.float32)
    if tl is None:
        tl = _pick_seq_block(L, C, x.dtype.itemsize, budget)
    nl = pl.cdiv(L, tl)

    k1 = functools.partial(_ln_sum_kernel, inv_c=1.0 / C)
    x_hat, seq_sum = pl.pallas_call(
        k1,
        out_shape=(jax.ShapeDtypeStruct((B, L, C), x.dtype),
                   jax.ShapeDtypeStruct((B, 1, C), jnp.float32)),
        grid_spec=pltpu.PrefetchScalarGridSpec(
            num_scalar_prefetch=0,
            grid=(B, nl),
            in_specs=[
                pl.BlockSpec((1, tl, C), lambda i, j: (i, j, 0)),
                pl.BlockSpec((1, 1, C), lambda i, j: (0, 0, 0)),
                pl.BlockSpec((1, 1, C), lambda i, j: (0, 0, 0)),
            ],
            out_specs=(
                pl.BlockSpec((1, tl, C), lambda i, j: (i, j, 0)),
                pl.BlockSpec((1, 1, C), lambda i, j: (i, 0, 0)),
            ),
        ),
        compiler_params=pltpu.CompilerParams(
            dimension_semantics=("parallel", "arbitrary"),
            vmem_limit_bytes=limit,
        ),
    )(x, g, b)

    k2 = functools.partial(_sub_bias_kernel, inv_l=1.0 / L)
    out = pl.pallas_call(
        k2,
        out_shape=jax.ShapeDtypeStruct((B, L, C), x.dtype),
        grid_spec=pltpu.PrefetchScalarGridSpec(
            num_scalar_prefetch=0,
            grid=(B, nl),
            in_specs=[
                pl.BlockSpec((1, tl, C), lambda i, j: (i, j, 0)),
                pl.BlockSpec((1, 1, C), lambda i, j: (i, 0, 0)),
            ],
            out_specs=pl.BlockSpec((1, tl, C), lambda i, j: (i, j, 0)),
        ),
        compiler_params=pltpu.CompilerParams(
            dimension_semantics=("parallel", "parallel"),
            vmem_limit_bytes=limit,
        ),
    )(x_hat, seq_sum)
    return out


# ----------------------------------------------------------------------------
# Public wrapper.
# ----------------------------------------------------------------------------
def my_layernorm(x, gamma, beta):
    """x: (B, L, C); gamma, beta: (C,). Returns (B, L, C)."""
    B, L, C = x.shape
    limit, budget = _vmem_caps()
    tb = _pick_batch_block(B, L, C, x.dtype.itemsize, budget)
    if tb == 0:
        # Single-batch block does not fit VMEM (large L*C, e.g. v7x): two-pass.
        return _my_layernorm_two_pass(x, gamma, beta, limit, budget)

    g = gamma.reshape(1, 1, C).astype(jnp.float32)
    b = beta.reshape(1, 1, C).astype(jnp.float32)
    kernel = functools.partial(_my_layernorm_kernel, inv_c=1.0 / C, inv_l=1.0 / L)

    return pl.pallas_call(
        kernel,
        out_shape=jax.ShapeDtypeStruct((B, L, C), x.dtype),
        grid_spec=pltpu.PrefetchScalarGridSpec(
            num_scalar_prefetch=0,
            grid=(pl.cdiv(B, tb),),
            in_specs=[
                pl.BlockSpec((tb, L, C), lambda i: (i, 0, 0)),
                pl.BlockSpec((1, 1, C), lambda i: (0, 0, 0)),
                pl.BlockSpec((1, 1, C), lambda i: (0, 0, 0)),
            ],
            out_specs=pl.BlockSpec((tb, L, C), lambda i: (i, 0, 0)),
        ),
        compiler_params=pltpu.CompilerParams(
            dimension_semantics=("parallel",),
            vmem_limit_bytes=limit,
        ),
    )(x, g, b)


def my_layernorm_ref(x, gamma, beta):
    """Pure-JAX reference mirroring the PyTorch forward."""
    xf = x.astype(jnp.float32)
    mean = jnp.mean(xf, axis=-1, keepdims=True)
    var = jnp.mean((xf - mean) ** 2, axis=-1, keepdims=True)
    x_hat = (xf - mean) / jnp.sqrt(var + EPS)
    x_hat = x_hat * gamma + beta
    bias = jnp.mean(x_hat, axis=1, keepdims=True)
    return (x_hat - bias).astype(x.dtype)


if __name__ == "__main__":
    key = jax.random.PRNGKey(0)
    B, L, C = 2, 8, 32  # small [batch, seq, channels] demo shapes

    kx, kg, kb = jax.random.split(key, 3)
    x = jax.random.normal(kx, (B, L, C), dtype=jnp.float32)
    # nn.LayerNorm default init is weight=1, bias=0; perturb deterministically
    # so the affine path is exercised.
    gamma = jnp.ones((C,), jnp.float32) + 0.1 * jax.random.normal(kg, (C,), jnp.float32)
    beta = 0.1 * jax.random.normal(kb, (C,), jnp.float32)

    # Fused single-pass path.
    out = jax.block_until_ready(my_layernorm(x, gamma, beta))
    ref = my_layernorm_ref(x, gamma, beta)
    assert out.shape == (B, L, C)
    assert jnp.max(jnp.abs(out - ref)) < 5e-5, "mismatch vs reference"

    # Same path on mildly offset/scaled data (two-pass variance stays stable).
    x_off = 4.0 * x + 7.0
    out_off = jax.block_until_ready(my_layernorm(x_off, gamma, beta))
    ref_off = my_layernorm_ref(x_off, gamma, beta)
    assert jnp.max(jnp.abs(out_off - ref_off)) < 5e-5, "mismatch (offset data)"

    # Exercise the two-pass L-tiled fallback path at a small shape (L=16, tl=8).
    x2 = 3.0 * jax.random.normal(kx, (2, 16, C), dtype=jnp.float32) + 5.0
    limit, budget = _vmem_caps()
    out2 = jax.block_until_ready(
        _my_layernorm_two_pass(x2, gamma, beta, limit, budget, tl=8))
    ref2 = my_layernorm_ref(x2, gamma, beta)
    assert out2.shape == x2.shape
    assert jnp.max(jnp.abs(out2 - ref2)) < 5e-5, "mismatch (two-pass fallback)"

    print("KERNEL_OK")
</pallas_src>

<mosaic_0001>
module attributes {stable_mosaic.version = 11 : i64} {
  func.func @_my_layernorm_kernel(%arg0: i32, %arg1: memref<2x8x32xf32, #tpu.memory_space<vmem>>, %arg2: memref<1x1x32xf32, #tpu.memory_space<vmem>>, %arg3: memref<1x1x32xf32, #tpu.memory_space<vmem>>, %arg4: memref<2x8x32xf32, #tpu.memory_space<vmem>>) attributes {dimension_semantics = [#tpu.dimension_semantics<parallel>], iteration_bounds = array<i64: 1>, scalar_prefetch = 0 : i64, scratch_operands = 0 : i64, tpu.core_type = #tpu.core_type<tc>, window_params = [{transform_indices = @transform_0, window_bounds = array<i64: 2, 8, 32>}, {pipeline_mode = #tpu.pipeline_mode<synchronous>, transform_indices = @transform_1, window_bounds = array<i64: 1, 1, 32>}, {pipeline_mode = #tpu.pipeline_mode<synchronous>, transform_indices = @transform_2, window_bounds = array<i64: 1, 1, 32>}, {transform_indices = @transform_3, window_bounds = array<i64: 2, 8, 32>}]} {
    %c0 = arith.constant 0 : index
    %c0_0 = arith.constant 0 : index
    %c0_1 = arith.constant 0 : index
    %0 = vector.load %arg1[%c0, %c0_0, %c0_1] : memref<2x8x32xf32, #tpu.memory_space<vmem>>, vector<2x8x32xf32>
    %cst = arith.constant dense<0.000000e+00> : vector<2x8xf32>
    %1 = vector.multi_reduction <add>, %0, %cst [2] : vector<2x8x32xf32> to vector<2x8xf32>
    %2 = vector.shape_cast %1 : vector<2x8xf32> to vector<2x8x1xf32>
    %cst_2 = arith.constant 3.125000e-02 : f32
    %3 = vector.broadcast %cst_2 : f32 to vector<2x8x1xf32>
    %4 = arith.mulf %2, %3 : vector<2x8x1xf32>
    %5 = vector.broadcast %4 : vector<2x8x1xf32> to vector<2x8x32xf32>
    %6 = arith.subf %0, %5 : vector<2x8x32xf32>
    %7 = arith.mulf %6, %6 : vector<2x8x32xf32>
    %cst_3 = arith.constant dense<0.000000e+00> : vector<2x8xf32>
    %8 = vector.multi_reduction <add>, %7, %cst_3 [2] : vector<2x8x32xf32> to vector<2x8xf32>
    %9 = vector.shape_cast %8 : vector<2x8xf32> to vector<2x8x1xf32>
    %cst_4 = arith.constant 3.125000e-02 : f32
    %10 = vector.broadcast %cst_4 : f32 to vector<2x8x1xf32>
    %11 = arith.mulf %9, %10 : vector<2x8x1xf32>
    %cst_5 = arith.constant 9.99999974E-6 : f32
    %12 = vector.broadcast %cst_5 : f32 to vector<2x8x1xf32>
    %13 = arith.addf %11, %12 : vector<2x8x1xf32>
    %14 = math.rsqrt %13 : vector<2x8x1xf32>
    %15 = vector.broadcast %14 : vector<2x8x1xf32> to vector<2x8x32xf32>
    %16 = arith.mulf %6, %15 : vector<2x8x32xf32>
    %c0_6 = arith.constant 0 : index
    %c0_7 = arith.constant 0 : index
    %c0_8 = arith.constant 0 : index
    %17 = vector.load %arg2[%c0_6, %c0_7, %c0_8] : memref<1x1x32xf32, #tpu.memory_space<vmem>>, vector<1x1x32xf32>
    %18 = vector.broadcast %17 : vector<1x1x32xf32> to vector<2x8x32xf32>
    %19 = arith.mulf %16, %18 : vector<2x8x32xf32>
    %c0_9 = arith.constant 0 : index
    %c0_10 = arith.constant 0 : index
    %c0_11 = arith.constant 0 : index
    %20 = vector.load %arg3[%c0_9, %c0_10, %c0_11] : memref<1x1x32xf32, #tpu.memory_space<vmem>>, vector<1x1x32xf32>
    %21 = vector.broadcast %20 : vector<1x1x32xf32> to vector<2x8x32xf32>
    %22 = arith.addf %19, %21 : vector<2x8x32xf32>
    %cst_12 = arith.constant dense<0.000000e+00> : vector<2x32xf32>
    %23 = vector.multi_reduction <add>, %22, %cst_12 [1] : vector<2x8x32xf32> to vector<2x32xf32>
    %24 = vector.shape_cast %23 : vector<2x32xf32> to vector<2x1x32xf32>
    %cst_13 = arith.constant 1.250000e-01 : f32
    %25 = vector.broadcast %cst_13 : f32 to vector<2x1x32xf32>
    %26 = arith.mulf %24, %25 : vector<2x1x32xf32>
    %27 = vector.broadcast %26 : vector<2x1x32xf32> to vector<2x8x32xf32>
    %28 = arith.subf %22, %27 : vector<2x8x32xf32>
    %c0_14 = arith.constant 0 : index
    %c0_15 = arith.constant 0 : index
    %c0_16 = arith.constant 0 : index
    %29 = vector.load %arg4[%c0_14, %c0_15, %c0_16] : memref<2x8x32xf32, #tpu.memory_space<vmem>>, vector<2x8x32xf32>
    tpu.vector_store %arg4[%c0_14, %c0_15, %c0_16], %28 {strides = array<i32>} : memref<2x8x32xf32, #tpu.memory_space<vmem>>, vector<2x8x32xf32>,
    return
  }
  func.func @transform_0(%arg0: i32) -> (i32, i32, i32) {
    %c0_i32 = arith.constant 0 : i32
    %c0_i32_0 = arith.constant 0 : i32
    %c0_i32_1 = arith.constant 0 : i32
    return %arg0, %c0_i32, %c0_i32_0 : i32, i32, i32
  }
  func.func @transform_1(%arg0: i32) -> (i32, i32, i32) {
    %c0_i32 = arith.constant 0 : i32
    %c0_i32_0 = arith.constant 0 : i32
    %c0_i32_1 = arith.constant 0 : i32
    %c0_i32_2 = arith.constant 0 : i32
    return %c0_i32, %c0_i32_0, %c0_i32_1 : i32, i32, i32
  }
  func.func @transform_2(%arg0: i32) -> (i32, i32, i32) {
    %c0_i32 = arith.constant 0 : i32
    %c0_i32_0 = arith.constant 0 : i32
    %c0_i32_1 = arith.constant 0 : i32
    %c0_i32_2 = arith.constant 0 : i32
    return %c0_i32, %c0_i32_0, %c0_i32_1 : i32, i32, i32
  }
  func.func @transform_3(%arg0: i32) -> (i32, i32, i32) {
    %c0_i32 = arith.constant 0 : i32
    %c0_i32_0 = arith.constant 0 : i32
    %c0_i32_1 = arith.constant 0 : i32
    return %arg0, %c0_i32, %c0_i32_0 : i32, i32, i32
  }
}

</mosaic_0001>

<bundles_post_ra>
// kernel: tpu_custom_call.1
= control target key start
LH: loop header
LB: loop body
LE: loop exit
PB: predicated region body
PF: predicated region fallthrough
CT: control target
= control target key end

     0   :  { %8 = vsyncpa [#allocation3], 0  ;;  %s239_s0 = inlined_call_operand.hbm [shape: f32[2,8,32], index: 0, kind: input, shape index: {}]   ;;  %s240_s1 = inlined_call_operand.vmem [shape: f32[1,1,32], index: 1, kind: input, shape index: {}]   ;;  %s241_s2 = inlined_call_operand.vmem [shape: f32[1,1,32], index: 2, kind: input, shape index: {}]   ;;  %s242_s3 = inlined_call_operand.hbm [shape: f32[2,8,32], index: 3, kind: output, shape index: {}]  }
   0x1   :  { %9 = vsyncpa [#allocation4], 0  ;;  %s171_s12 = smov [#allocation2]   ;;  %s123_s16 = scalar_lea.hbm %s239_s0, 256 }
   0x2   :  { %s15_s13 = sshll.u32 %s171_s12, 4  ;;  %p124_p0 = scmp.ne.s32.totalorder %s239_s0, %s123_s16  ;;  %s16_s13 = int_to_ptr.vmem [resolvable:$true] %s15_s13 }
   0x3   :  { %p127_p1 = scmp.lt.u32.totalorder %s123_s16, %s239_s0 }
   0x5   :  { %p129_p2 = pnand %p127_p1, %p124_p0 }
   0x7   :  { %132 = shalt.err (!%p129_p2)
}
   0x8   :  { %s133_s21 = scalar_lea.vmem %s16_s13, 256  ;;  %p138_p4 = scmp.lt.s32.totalorder %s16_s13, %s16_s13 }
   0x9   :  { %p134_p3 = scmp.ne.s32.totalorder %s16_s13, %s133_s21  ;;  %p139_p5 = scmp.lt.s32.totalorder %s133_s21, %s133_s21 }
   0xb   :  { %p140_p6 = por %p139_p5, %p138_p4 }
   0xd   :  { %p141_p7 = pnand %p140_p6, %p134_p3 }
   0xf   :  { %144 = shalt.err (!%p141_p7)
}
  0x10   :  { %s172_s22 = smov 128   ;;  %s173_s23 = smov 8  }
  0x11   :  { %21 = dma.hbm_to_vmem [thread:$0]  %s239_s0, 256, %s16_s13, [#allocation3], %s172_s22, %s172_s22, %s173_s23  }
  0x12   :  { %167 = dma.done.wait [#allocation3], 256  }
  0x13   :  { %168 = vsyncadd [#allocation3], 4294967040  ;;  %vm31_vm0 = vcmask 261120   ;;  %v29_v0 = vld [vmem:[#allocation2] sm:$0xff]  ;;  %v30_v1 = vld [vmem:[#allocation2 + $0x8] sm:$0xff] }
  0x14   :  { %v32_v2 = vsel %vm31_vm0, %v29_v0, 0.0  ;;  %v35_v3 = vsel %vm31_vm0, %v30_v1, 0.0  ;;  %v113_v21 = vld [vmem:[%s240_s1] ss:$0 sm:$0xff]  ;;  %s174_s1 = smov [#allocation5]  }
  0x15   :  { %33 = vadd.xlane.f32.xlu0 %v32_v2  ;;  %v114_v23 = vld [vmem:[%s241_s2] ss:$0 sm:$0xff]  ;;  %s101_s2 = sshll.u32 %s174_s1, 4  ;;  %s102_s2 = int_to_ptr.vmem [resolvable:$true] %s101_s2 }
  0x16   :  { %s145_s29 = scalar_lea.vmem %s102_s2, 256  ;;  %p150_p9 = scmp.lt.s32.totalorder %s102_s2, %s102_s2 }
  0x17   :  { %p146_p8 = scmp.ne.s32.totalorder %s102_s2, %s145_s29  ;;  %p151_p10 = scmp.lt.s32.totalorder %s145_s29, %s145_s29 }
  0x19   :  { %36 = vadd.xlane.f32.xlu0 %v35_v3  ;;  %p152_p11 = por %p151_p10, %p150_p9 }
  0x1b   :  { %p153_p12 = pnand %p152_p11, %p146_p8 }
  0xa2   :  { %v34_v4 = vpop.xlane.xlu0 %33 }
  0xa3   :  { %v38_v5 = vmul.f32 0.03125, %v34_v4 }
  0xa5   :  { %v40_v6 = vsub.f32 %v29_v0, %v38_v5 }
  0xa6   :  { %v37_v7 = vpop.xlane.xlu0 %36 }
  0xa7   :  { %v39_v8 = vmul.f32 0.03125, %v37_v7  ;;  %v42_v9 = vmul.f32 %v40_v6, %v40_v6 }
  0xa9   :  { %v41_v10 = vsub.f32 %v30_v1, %v39_v8  ;;  %v44_v11 = vsel %vm31_vm0, %v42_v9, 0.0 }
  0xaa   :  { %45 = vadd.xlane.f32.xlu1 %v44_v11 }
  0xab   :  { %v43_v12 = vmul.f32 %v41_v10, %v41_v10 }
  0xad   :  { %v47_v13 = vsel %vm31_vm0, %v43_v12, 0.0 }
  0xae   :  { %48 = vadd.xlane.f32.xlu1 %v47_v13 }
 0x137   :  { %v46_v14 = vpop.xlane.xlu1 %45 }
 0x138   :  { %v50_v15 = vmul.f32 0.03125, %v46_v14 }
 0x13a   :  { %v52_v16 = vadd.f32 1e-05, %v50_v15 }
 0x13b   :  { %v49_v17 = vpop.xlane.xlu1 %48 }
 0x13c   :  { %119 = vrsqrt.f32 %v52_v16  ;;  %v51_v18 = vmul.f32 0.03125, %v49_v17 }
 0x13e   :  { %v53_v19 = vadd.f32 1e-05, %v51_v18 }
 0x140   :  { %121 = vrsqrt.f32 %v53_v19 }
 0x146   :  { %v120_v20 = vpop.eup %119 }
 0x147   :  { %v56_v22 = vmul.f32 %v120_v20, %v40_v6 }
 0x149   :  { %v65_v24 = vmul.f32 %v113_v21, %v56_v22 }
 0x14a   :  { %v122_v25 = vpop.eup %121 }
 0x14b   :  { %v57_v26 = vmul.f32 %v122_v25, %v41_v10  ;;  %v74_v27 = vadd.f32 %v114_v23, %v65_v24 }
 0x14d   :  { %v66_v28 = vmul.f32 %v113_v21, %v57_v26  ;;  %v76_v29 = vsel %vm31_vm0, %v74_v27, 0.0 }
 0x14e   :  { %v77_v30 = vrot.slane %v76_v29, 4 }
 0x14f   :  { %v75_v31 = vadd.f32 %v114_v23, %v66_v28 }
 0x150   :  { %v78_v32 = vadd.f32 %v77_v30, %v76_v29 }
 0x151   :  { %v83_v33 = vsel %vm31_vm0, %v75_v31, 0.0 }
 0x152   :  { %v79_v34 = vrot.slane %v78_v32, 2  ;;  %v84_v35 = vrot.slane %v83_v33, 4 }
 0x154   :  { %v80_v36 = vadd.f32 %v79_v34, %v78_v32  ;;  %v85_v37 = vadd.f32 %v84_v35, %v83_v33 }
 0x156   :  { %v81_v38 = vrot.slane %v80_v36, 1  ;;  %v86_v39 = vrot.slane %v85_v37, 2 }
 0x158   :  { %v82_v40 = vadd.f32 %v81_v38, %v80_v36  ;;  %v87_v41 = vadd.f32 %v86_v39, %v85_v37 }
 0x15a   :  { %v88_v42 = vrot.slane %v87_v41, 1  ;;  %v90_v43 = vmul.f32 0.125, %v82_v40 }
 0x15c   :  { %v89_v44 = vadd.f32 %v88_v42, %v87_v41  ;;  %v92_v45 = vsub.f32 %v74_v27, %v90_v43 }
 0x15e   :  { %v91_v46 = vmul.f32 0.125, %v89_v44  ;;  %94 = vst.msk [vmem:[#allocation5] sm:$0xff] %vm31_vm0, %v92_v45 }
 0x160   :  { %v93_v47 = vsub.f32 %v75_v31, %v91_v46 }
 0x162   :  { %95 = vst.msk [vmem:[#allocation5 + $0x8] sm:$0xff] %vm31_vm0, %v93_v47 }
 0x163   :  { %156 = shalt.err (!%p153_p12)
}
 0x164   :  { %s157_s5 = scalar_lea.hbm %s242_s3, 256 }
 0x165   :  { %p158_p13 = scmp.ne.s32.totalorder %s242_s3, %s157_s5  ;;  %p161_p0 = scmp.lt.u32.totalorder %s157_s5, %s242_s3 }
 0x167   :  { %p163_p1 = pnand %p161_p0, %p158_p13 }
 0x169   :  { %166 = shalt.err (!%p163_p1)
}
 0x16a   :  { %107 = dma.vmem_to_hbm [thread:$0]  %s102_s2, 256, %s242_s3, [#allocation4], %s172_s22, %s172_s22, %s173_s23  }
 0x16b   :  { %169 = dma.done.wait [#allocation4], 256  }
 0x16c   :  { %170 = vsyncadd [#allocation4], 4294967040 }
 0x16d   :  { %111 = vsyncpa [#allocation3], 1 }
 0x16e   :  { %112 = vsyncpa [#allocation4], 1 }

</bundles_post_ra>
